<compile_context>
chip_gen: v7x
topology: tpu7x:2x2x1
jax: 0.10.0
libtpu: 0.0.40
codegen_flags: <defaults>
</compile_context>

<pallas_src>
import math

import jax
import jax.numpy as jnp
from jax.experimental import pallas as pl
from jax.experimental.pallas import tpu as pltpu


# ---------------------------------------------------------------------------
# Weight folding: Conv2d(3x3, pad=1, no bias) + PixelUnshuffle(2) -> (16*Cin, 2*Cin)
# ---------------------------------------------------------------------------
def _fold_downsample_weights(w_conv):
    """W2[qy*2+qx][(iy*2+ix)*C + ci, 4*co + (i*2+j)] = w[co, ci, 2qy+iy-i, 2qx+ix-j] (0 if OOB)."""
    c_half, c_in, _, _ = w_conv.shape
    w2 = jnp.zeros((2, 2, 4 * c_in, 4 * c_half), w_conv.dtype)
    for qy in range(2):
        for qx in range(2):
            for iy in range(2):
                for ix in range(2):
                    for i in range(2):
                        for j in range(2):
                            dy = 2 * qy + iy - i
                            dx = 2 * qx + ix - j
                            if 0 <= dy <= 2 and 0 <= dx <= 2:
                                blk = w_conv[:, :, dy, dx].T          # (Cin, Chalf)
                                rs = (iy * 2 + ix) * c_in
                                w2 = w2.at[qy, qx, rs:rs + c_in,
                                           (i * 2 + j)::4].set(blk)
    return w2.reshape(4, 4 * c_in, 4 * c_half)


# ---------------------------------------------------------------------------
# Kernel: one (batch, row-tile) block = in-VMEM s2d repack + single MXU matmul
# ---------------------------------------------------------------------------
def _downsample_kernel(main_ref, top_ref, bot_ref, w_ref, o_ref, slab_ref):
    # main_ref: (1, 2*ty, Wo, 2C)  raw rows [2*y0, 2*y0+2*ty) of this tile (col pairs fused)
    # top_ref : (1, 1, Wo, 2C)     raw row 2*y0-1      (content zeroed on the first tile)
    # bot_ref : (1, 1, Wo, 2C)     raw row 2*(y0+ty)   (content zeroed on the last tile)
    # w_ref   : (16C, 2C)          folded conv+unshuffle weights (resident in VMEM)
    # o_ref   : (1, ty*Wo, 2C)     final 'b (h w) c' layout block
    # slab_ref: VMEM (ty*Wo, 16C)  explicit scratch for the im2col-style slab
    _, ty2, wo, c2 = main_ref.shape
    ty = ty2 // 2
    c = c2 // 2
    k = 4 * c
    dt = main_ref.dtype
    i = pl.program_id(1)
    last = pl.num_programs(1) - 1

    main = main_ref[0].reshape(ty, 2, wo, c2)               # free split of the major row dim
    top = top_ref[0, 0] * (i > 0).astype(dt)                # (Wo, 2C); zero pad-row on tile 0
    bot = bot_ref[0, 0] * (i < last).astype(dt)             # (Wo, 2C); zero pad-row on last tile

    # Rows regrouped by conv row tap parity: rows_iyN[Yl] = raw row 2*(y0+Yl) + N - 1.
    rows_iy0 = jnp.concatenate([top[None], main[:, 1]], axis=0)      # (ty+1, Wo, 2C)
    rows_iy1 = jnp.concatenate([main[:, 0], bot[None]], axis=0)      # (ty+1, Wo, 2C)

    # Column taps: the free (.., Wo, 2C) reshape already pairs raw cols (2X, 2X+1); the
    # conv's shifted pairing (2X-1, 2X) is a one-column zero-padded shift of the halves.
    zc = jnp.zeros((ty + 1, 1, c), dt)

    def col_taps(rows):
        return (jnp.concatenate([zc, rows[:, :, c:]], axis=1),       # ix=0: raw col 2X'-1
                jnp.concatenate([rows[:, :, :c], zc], axis=1))       # ix=1: raw col 2X'

    p00, p01 = col_taps(rows_iy0)
    p10, p11 = col_taps(rows_iy1)
    # packed[Yl, X', (iy*2+ix)*C+ci] == zero-padded x[2*(y0+Yl)+iy-1, 2*X'+ix-1, ci]
    packed = jnp.concatenate([p00, p01, p10, p11], axis=-1)          # (ty+1, Wo+1, 4C)

    # im2col slab: 4 shifted windows side by side -> ONE (ty*Wo, 16C) @ (16C, 2C) matmul.
    for t, (qy, qx) in enumerate(((0, 0), (0, 1), (1, 0), (1, 1))):
        slab_ref[:, t * k:(t + 1) * k] = (
            packed[qy:qy + ty, qx:qx + wo, :].reshape(ty * wo, k))

    acc = jnp.dot(slab_ref[...], w_ref[...], preferred_element_type=jnp.float32)
    o_ref[0] = acc.astype(o_ref.dtype)


# ---------------------------------------------------------------------------
# Wrapper
# ---------------------------------------------------------------------------
def _pick_row_tile(B, Ho, Wo, C, itemsize):
    """Largest row tile (divisor of Ho) keeping the per-step VMEM working set small while
    still yielding enough grid steps for pipelining / dual-TC sharding."""
    budget = 8 * 1024 * 1024
    # main+out (double buffered) + slab scratch + repack temps, in bytes per output super-row
    per_row = max(1, itemsize * Wo * C * 56)
    cap = max(1, budget // per_row)
    aligned = [d for d in range(1, Ho + 1)
               if Ho % d == 0 and ((d * Wo) % 8 == 0 or d == Ho)]
    cands = [d for d in aligned if d <= cap] or aligned[:1]
    want_tiles = max(1, -(-8 // B))            # aim for >= ~8 total grid steps
    pref = [d for d in cands if (Ho // d) >= want_tiles]
    return max(pref) if pref else max(cands)


@jax.jit
def downsample(x, w_conv):
    """x: (B, H*W, C) channels-last tokens; w_conv: (C//2, C, 3, 3) PyTorch conv weight."""
    B, N, C = x.shape
    H = int(round(math.sqrt(N)))
    if H * H != N or H % 2:
        raise ValueError("Downsample expects a square, even-sided token grid")
    c_half = w_conv.shape[0]
    cout = 4 * c_half                          # == 2*C
    K = 4 * C
    Ho, Wo = H // 2, H // 2
    itemsize = jnp.dtype(x.dtype).itemsize

    ty = _pick_row_tile(B, Ho, Wo, C, itemsize)
    T = Ho // ty

    # FREE metadata reshape (no HBM pass): pairs adjacent columns -> (B, H, Wo, 2C).
    x4 = x.reshape(B, H, Wo, 2 * C)

    # Folded weights (tiny, constant block -> stays resident in VMEM). Kept in the input
    # dtype so bf16 activations feed the MXU natively; f32 stays f32 (accumulation is f32).
    w2 = _fold_downsample_weights(w_conv).reshape(4 * K, cout).astype(x.dtype)

    main_spec = pl.BlockSpec((1, 2 * ty, Wo, 2 * C), lambda b, i: (b, i, 0, 0))
    top_spec = pl.BlockSpec((1, 1, Wo, 2 * C),
                            lambda b, i: (b, jnp.maximum(2 * i * ty - 1, 0), 0, 0))
    bot_spec = pl.BlockSpec((1, 1, Wo, 2 * C),
                            lambda b, i: (b, jnp.minimum(2 * (i + 1) * ty, H - 1), 0, 0))
    w_spec = pl.BlockSpec((4 * K, cout), lambda b, i: (0, 0))
    out_spec = pl.BlockSpec((1, ty * Wo, cout), lambda b, i: (b, i, 0))

    return pl.pallas_call(
        _downsample_kernel,
        grid=(B, T),
        in_specs=[main_spec, top_spec, bot_spec, w_spec],
        out_specs=out_spec,
        out_shape=jax.ShapeDtypeStruct((B, Ho * Wo, cout), x.dtype),
        scratch_shapes=[pltpu.VMEM((ty * Wo, 4 * K), x.dtype)],
        compiler_params=pltpu.CompilerParams(
            dimension_semantics=("parallel", "parallel"),
            vmem_limit_bytes=32 * 1024 * 1024),
        cost_estimate=pl.CostEstimate(
            flops=2 * B * Ho * Wo * (4 * K) * cout,
            transcendentals=0,
            bytes_accessed=itemsize * (x.size + w2.size + B * Ho * Wo * cout)),
    )(x4, x4, x4, w2)


# ---------------------------------------------------------------------------
# Pure-JAX reference mirroring the PyTorch forward (for validation)
# ---------------------------------------------------------------------------
def reference(x, w_conv):
    B, N, C = x.shape
    H = W = int(round(math.sqrt(N)))
    c_half = w_conv.shape[0]
    y = x.reshape(B, H, W, C).transpose(0, 3, 1, 2)          # b (h w) c -> b c h w
    y = jax.lax.conv_general_dilated(
        y, w_conv, window_strides=(1, 1), padding=((1, 1), (1, 1)),
        dimension_numbers=("NCHW", "OIHW", "NCHW"),
        precision=jax.lax.Precision.HIGHEST)
    # PixelUnshuffle(2): (B, c_half, H, W) -> (B, 4*c_half, H/2, W/2)
    y = y.reshape(B, c_half, H // 2, 2, W // 2, 2)
    y = y.transpose(0, 1, 3, 5, 2, 4).reshape(B, 4 * c_half, H // 2, W // 2)
    return y.transpose(0, 2, 3, 1).reshape(B, (H // 2) * (W // 2), 4 * c_half)


if __name__ == "__main__":
    B, C, H = 2, 32, 16          # tokens: x = (B, H*W, C) = (2, 256, 32)
    N = H * H
    key = jax.random.PRNGKey(0)
    kx, kw = jax.random.split(key)
    x = jax.random.normal(kx, (B, N, C), jnp.float32)
    lim = 1.0 / math.sqrt(C * 3 * 3)
    w_conv = jax.random.uniform(kw, (C // 2, C, 3, 3), jnp.float32, -lim, lim)

    out = jax.block_until_ready(downsample(x, w_conv))
    ref = jax.block_until_ready(reference(x, w_conv))

    assert out.shape == (B, N // 4, 2 * C), out.shape
    max_err = float(jnp.max(jnp.abs(out - ref)))
    # Kernel uses the MXU's default f32 path (bf16-multiply passes) vs a HIGHEST-precision
    # reference; structural / indexing bugs show up as O(1) errors, so this tolerance still
    # fully validates the conv+unshuffle fold and the halo/repack logic.
    assert jnp.allclose(out, ref, rtol=2e-2, atol=2e-2), max_err
    print("KERNEL_OK")
</pallas_src>

<mosaic_0001>
module attributes {stable_mosaic.version = 11 : i64} {
  func.func @_downsample_kernel(%arg0: i32, %arg1: i32, %arg2: memref<1x4x8x64xf32, #tpu.memory_space<vmem>>, %arg3: memref<1x1x8x64xf32, #tpu.memory_space<vmem>>, %arg4: memref<1x1x8x64xf32, #tpu.memory_space<vmem>>, %arg5: memref<512x64xf32, #tpu.memory_space<vmem>>, %arg6: memref<1x16x64xf32, #tpu.memory_space<vmem>>, %arg7: memref<16x512xf32, #tpu.memory_space<vmem>>) attributes {dimension_semantics = [#tpu.dimension_semantics<parallel>, #tpu.dimension_semantics<parallel>], iteration_bounds = array<i64: 2, 4>, scalar_prefetch = 0 : i64, scratch_operands = 1 : i64, tpu.core_type = #tpu.core_type<tc>, window_params = [{transform_indices = @transform_0, window_bounds = array<i64: 1, 4, 8, 64>}, {transform_indices = @transform_1, window_bounds = array<i64: 1, 1, 8, 64>}, {transform_indices = @transform_2, window_bounds = array<i64: 1, 1, 8, 64>}, {pipeline_mode = #tpu.pipeline_mode<synchronous>, transform_indices = @transform_3, window_bounds = array<i64: 512, 64>}, {transform_indices = @transform_4, window_bounds = array<i64: 1, 16, 64>}]} {
    %c0 = arith.constant 0 : index
    %c0_0 = arith.constant 0 : index
    %c0_1 = arith.constant 0 : index
    %c0_2 = arith.constant 0 : index
    %0 = vector.load %arg2[%c0, %c0_0, %c0_1, %c0_2] : memref<1x4x8x64xf32, #tpu.memory_space<vmem>>, vector<1x4x8x64xf32>
    %1 = vector.shape_cast %0 : vector<1x4x8x64xf32> to vector<4x8x64xf32>
    %2 = vector.shape_cast %1 : vector<4x8x64xf32> to vector<2x2x8x64xf32>
    %c0_3 = arith.constant 0 : index
    %c0_4 = arith.constant 0 : index
    %c0_5 = arith.constant 0 : index
    %c0_6 = arith.constant 0 : index
    %3 = vector.load %arg3[%c0_3, %c0_4, %c0_5, %c0_6] : memref<1x1x8x64xf32, #tpu.memory_space<vmem>>, vector<1x1x8x64xf32>
    %4 = vector.shape_cast %3 : vector<1x1x8x64xf32> to vector<8x64xf32>
    %c0_i32 = arith.constant 0 : i32
    %5 = arith.cmpi sgt, %arg1, %c0_i32 : i32
    %6 = arith.extui %5 : i1 to i32
    %7 = arith.sitofp %6 : i32 to f32
    %8 = vector.broadcast %7 : f32 to vector<8x64xf32>
    %9 = arith.mulf %4, %8 : vector<8x64xf32>
    %c0_7 = arith.constant 0 : index
    %c0_8 = arith.constant 0 : index
    %c0_9 = arith.constant 0 : index
    %c0_10 = arith.constant 0 : index
    %10 = vector.load %arg4[%c0_7, %c0_8, %c0_9, %c0_10] : memref<1x1x8x64xf32, #tpu.memory_space<vmem>>, vector<1x1x8x64xf32>
    %11 = vector.shape_cast %10 : vector<1x1x8x64xf32> to vector<8x64xf32>
    %c3_i32 = arith.constant 3 : i32
    %12 = arith.cmpi slt, %arg1, %c3_i32 : i32
    %13 = arith.extui %12 : i1 to i32
    %14 = arith.sitofp %13 : i32 to f32
    %15 = vector.broadcast %14 : f32 to vector<8x64xf32>
    %16 = arith.mulf %11, %15 : vector<8x64xf32>
    %17 = vector.shape_cast %9 : vector<8x64xf32> to vector<1x8x64xf32>
    %18 = vector.extract_strided_slice %2 {offsets = [0, 1, 0, 0], sizes = [2, 1, 8, 64], strides = [1, 1, 1, 1]} : vector<2x2x8x64xf32> to vector<2x1x8x64xf32>
    %19 = vector.shape_cast %18 : vector<2x1x8x64xf32> to vector<2x8x64xf32>
    %20 = tpu.concatenate %17, %19 in 0 : vector<1x8x64xf32>, vector<2x8x64xf32> -> vector<3x8x64xf32>
    %21 = vector.extract_strided_slice %2 {offsets = [0, 0, 0, 0], sizes = [2, 1, 8, 64], strides = [1, 1, 1, 1]} : vector<2x2x8x64xf32> to vector<2x1x8x64xf32>
    %22 = vector.shape_cast %21 : vector<2x1x8x64xf32> to vector<2x8x64xf32>
    %23 = vector.shape_cast %16 : vector<8x64xf32> to vector<1x8x64xf32>
    %24 = tpu.concatenate %22, %23 in 0 : vector<2x8x64xf32>, vector<1x8x64xf32> -> vector<3x8x64xf32>
    %cst = arith.constant 0.000000e+00 : f32
    %25 = vector.broadcast %cst : f32 to vector<3x1x32xf32>
    %26 = vector.extract_strided_slice %20 {offsets = [0, 0, 32], sizes = [3, 8, 32], strides = [1, 1, 1]} : vector<3x8x64xf32> to vector<3x8x32xf32>
    %27 = tpu.concatenate %25, %26 in 1 : vector<3x1x32xf32>, vector<3x8x32xf32> -> vector<3x9x32xf32>
    %28 = vector.extract_strided_slice %20 {offsets = [0, 0, 0], sizes = [3, 8, 32], strides = [1, 1, 1]} : vector<3x8x64xf32> to vector<3x8x32xf32>
    %29 = tpu.concatenate %28, %25 in 1 : vector<3x8x32xf32>, vector<3x1x32xf32> -> vector<3x9x32xf32>
    %30 = vector.extract_strided_slice %24 {offsets = [0, 0, 32], sizes = [3, 8, 32], strides = [1, 1, 1]} : vector<3x8x64xf32> to vector<3x8x32xf32>
    %31 = tpu.concatenate %25, %30 in 1 : vector<3x1x32xf32>, vector<3x8x32xf32> -> vector<3x9x32xf32>
    %32 = vector.extract_strided_slice %24 {offsets = [0, 0, 0], sizes = [3, 8, 32], strides = [1, 1, 1]} : vector<3x8x64xf32> to vector<3x8x32xf32>
    %33 = tpu.concatenate %32, %25 in 1 : vector<3x8x32xf32>, vector<3x1x32xf32> -> vector<3x9x32xf32>
    %34 = tpu.concatenate %27, %29, %31, %33 in 2 : vector<3x9x32xf32>, vector<3x9x32xf32>, vector<3x9x32xf32>, vector<3x9x32xf32> -> vector<3x9x128xf32>
    %35 = vector.extract_strided_slice %34 {offsets = [0, 0, 0], sizes = [2, 8, 128], strides = [1, 1, 1]} : vector<3x9x128xf32> to vector<2x8x128xf32>
    %36 = vector.shape_cast %35 : vector<2x8x128xf32> to vector<16x128xf32>
    %c0_11 = arith.constant 0 : index
    %c0_12 = arith.constant 0 : index
    %37 = vector.load %arg7[%c0_11, %c0_12] : memref<16x512xf32, #tpu.memory_space<vmem>>, vector<16x128xf32>
    tpu.vector_store %arg7[%c0_11, %c0_12], %36 {strides = array<i32>} : memref<16x512xf32, #tpu.memory_space<vmem>>, vector<16x128xf32>,
    %38 = vector.extract_strided_slice %34 {offsets = [0, 1, 0], sizes = [2, 8, 128], strides = [1, 1, 1]} : vector<3x9x128xf32> to vector<2x8x128xf32>
    %39 = vector.shape_cast %38 : vector<2x8x128xf32> to vector<16x128xf32>
    %c0_13 = arith.constant 0 : index
    %c128 = arith.constant 128 : index
    %40 = vector.load %arg7[%c0_13, %c128] : memref<16x512xf32, #tpu.memory_space<vmem>>, vector<16x128xf32>
    tpu.vector_store %arg7[%c0_13, %c128], %39 {strides = array<i32>} : memref<16x512xf32, #tpu.memory_space<vmem>>, vector<16x128xf32>,
    %41 = vector.extract_strided_slice %34 {offsets = [1, 0, 0], sizes = [2, 8, 128], strides = [1, 1, 1]} : vector<3x9x128xf32> to vector<2x8x128xf32>
    %42 = vector.shape_cast %41 : vector<2x8x128xf32> to vector<16x128xf32>
    %c0_14 = arith.constant 0 : index
    %c256 = arith.constant 256 : index
    %43 = vector.load %arg7[%c0_14, %c256] : memref<16x512xf32, #tpu.memory_space<vmem>>, vector<16x128xf32>
    tpu.vector_store %arg7[%c0_14, %c256], %42 {strides = array<i32>} : memref<16x512xf32, #tpu.memory_space<vmem>>, vector<16x128xf32>,
    %44 = vector.extract_strided_slice %34 {offsets = [1, 1, 0], sizes = [2, 8, 128], strides = [1, 1, 1]} : vector<3x9x128xf32> to vector<2x8x128xf32>
    %45 = vector.shape_cast %44 : vector<2x8x128xf32> to vector<16x128xf32>
    %c0_15 = arith.constant 0 : index
    %c384 = arith.constant 384 : index
    %46 = vector.load %arg7[%c0_15, %c384] : memref<16x512xf32, #tpu.memory_space<vmem>>, vector<16x128xf32>
    tpu.vector_store %arg7[%c0_15, %c384], %45 {strides = array<i32>} : memref<16x512xf32, #tpu.memory_space<vmem>>, vector<16x128xf32>,
    %c0_16 = arith.constant 0 : index
    %c0_17 = arith.constant 0 : index
    %47 = vector.load %arg7[%c0_16, %c0_17] : memref<16x512xf32, #tpu.memory_space<vmem>>, vector<16x512xf32>
    %c0_18 = arith.constant 0 : index
    %c0_19 = arith.constant 0 : index
    %48 = vector.load %arg5[%c0_18, %c0_19] : memref<512x64xf32, #tpu.memory_space<vmem>>, vector<512x64xf32>
    %cst_20 = arith.constant dense<0.000000e+00> : vector<16x64xf32>
    %49 = tpu.matmul %47, %48, %cst_20 {dimension_numbers = #tpu.dot_dimension_numbers<[1], [0], [0], [1], [0, 0, 1, 1], [], []>} : vector<16x512xf32>, vector<512x64xf32>, vector<16x64xf32> -> vector<16x64xf32>
    %c0_21 = arith.constant 0 : index
    %c0_22 = arith.constant 0 : index
    %c0_23 = arith.constant 0 : index
    %50 = vector.load %arg6[%c0_21, %c0_22, %c0_23] : memref<1x16x64xf32, #tpu.memory_space<vmem>>, vector<1x16x64xf32>
    %51 = vector.shape_cast %50 : vector<1x16x64xf32> to vector<16x64xf32>
    %52 = vector.shape_cast %49 : vector<16x64xf32> to vector<1x16x64xf32>
    tpu.vector_store %arg6[%c0_21, %c0_22, %c0_23], %52 {strides = array<i32>} : memref<1x16x64xf32, #tpu.memory_space<vmem>>, vector<1x16x64xf32>,
    return
  }
  func.func @transform_0(%arg0: i32, %arg1: i32) -> (i32, i32, i32, i32) {
    %c0_i32 = arith.constant 0 : i32
    %c0_i32_0 = arith.constant 0 : i32
    %c0_i32_1 = arith.constant 0 : i32
    return %arg0, %arg1, %c0_i32, %c0_i32_0 : i32, i32, i32, i32
  }
  func.func @transform_1(%arg0: i32, %arg1: i32) -> (i32, i32, i32, i32) {
    %c2_i32 = arith.constant 2 : i32
    %0 = arith.muli %c2_i32, %arg1 : i32
    %c2_i32_0 = arith.constant 2 : i32
    %1 = arith.muli %0, %c2_i32_0 : i32
    %c1_i32 = arith.constant 1 : i32
    %2 = arith.subi %1, %c1_i32 : i32
    %c0_i32 = arith.constant 0 : i32
    %3 = arith.maxsi %2, %c0_i32 : i32
    %c0_i32_1 = arith.constant 0 : i32
    %c0_i32_2 = arith.constant 0 : i32
    %c0_i32_3 = arith.constant 0 : i32
    return %arg0, %3, %c0_i32_1, %c0_i32_2 : i32, i32, i32, i32
  }
  func.func @transform_2(%arg0: i32, %arg1: i32) -> (i32, i32, i32, i32) {
    %c1_i32 = arith.constant 1 : i32
    %0 = arith.addi %arg1, %c1_i32 : i32
    %c2_i32 = arith.constant 2 : i32
    %1 = arith.muli %c2_i32, %0 : i32
    %c2_i32_0 = arith.constant 2 : i32
    %2 = arith.muli %1, %c2_i32_0 : i32
    %c15_i32 = arith.constant 15 : i32
    %3 = arith.minsi %2, %c15_i32 : i32
    %c0_i32 = arith.constant 0 : i32
    %c0_i32_1 = arith.constant 0 : i32
    %c0_i32_2 = arith.constant 0 : i32
    return %arg0, %3, %c0_i32, %c0_i32_1 : i32, i32, i32, i32
  }
  func.func @transform_3(%arg0: i32, %arg1: i32) -> (i32, i32) {
    %c0_i32 = arith.constant 0 : i32
    %c0_i32_0 = arith.constant 0 : i32
    %c0_i32_1 = arith.constant 0 : i32
    return %c0_i32, %c0_i32_0 : i32, i32
  }
  func.func @transform_4(%arg0: i32, %arg1: i32) -> (i32, i32, i32) {
    %c0_i32 = arith.constant 0 : i32
    %c0_i32_0 = arith.constant 0 : i32
    return %arg0, %arg1, %c0_i32 : i32, i32, i32
  }
}

</mosaic_0001>

<bundles_post_ra>
// kernel: downsample.1
= control target key start
LH: loop header
LB: loop body
LE: loop exit
PB: predicated region body
PF: predicated region fallthrough
CT: control target
= control target key end

     0   :  { %s1710_s0 = inlined_call_operand.vmem [shape: f32[2,16,8,64], index: 0, kind: input, shape index: {}, may-alias: {0,1,2}]   ;;  %s1711_s1 = inlined_call_operand.vmem [shape: f32[2,16,8,64], index: 1, kind: input, shape index: {}, may-alias: {0,1,2}]   ;;  %s1712_s2 = inlined_call_operand.vmem [shape: f32[2,16,8,64], index: 2, kind: input, shape index: {}, may-alias: {0,1,2}]   ;;  %s1713_s3 = inlined_call_operand.vmem [shape: f32[512,64], index: 3, kind: input, shape index: {}]   ;;  %s1714_s4 = inlined_call_operand.hbm [shape: f32[2,64,64], index: 4, kind: output, shape index: {}]  }
   0x1   :  { %1717 = sst [smem:[#allocation8_spill]] %s1710_s0 }
   0x2   :  { %9 = vsyncpa [#allocation4], 0 }
   0x3   :  { %11 = vsyncpa [#allocation4 + $0x1], 0  ;;  %s1284_s15 = smov 0   ;;  %s1286_s16 = smov 0  }
   0x4   :  { %s1288_s17 = smov 0   ;;  %s1290_s18 = smov 0  }
   0x5   :  { %s1292_s19 = smov 0   ;;  %s1294_s20 = smov 0  }
   0x6   :  { %s1296_s21 = smov 0   ;;  %s1298_s22 = smov 0  }
   0x7 LB: > { %s850_s23 = sadd.s32 4294967295, %s1250_s22   ;;  %s851_s24 = sadd.s32 4294967294, %s1250_s22   ;;  %s1250_s22 = sphi %s1298_s22, %s17_s22   ;;  %s1246_s21 = sphi %s1296_s21, %s1732_s21   ;;  %s1242_s20 = sphi %s1294_s20, %s1731_s20   ;;  %s1238_s19 = sphi %s1292_s19, %s1730_s19   ;;  %s1234_s18 = sphi %s1290_s18, %s1729_s18   ;;  %s1230_s17 = sphi %s1288_s17, %s1728_s17   ;;  %s1226_s16 = sphi %s1286_s16, %s1727_s16   ;;  %s1222_s15 = sphi %s1284_s15, %s1726_s15  }
   0x8   : > { %s26_s25 = sadd.s32 1, %s1242_s20  ;;  %s29_s26 = sadd.s32 1, %s1246_s21 }
   0x9   : > { %p27_p0 = scmp.ge.s32.totalorder %s26_s25, 4  ;;  %p169_p1 = scmp.ne.s32.totalorder %s1230_s17, %s1226_s16 }
   0xa   : > { %p170_p2 = scmp.eq.s32.totalorder %s850_s23, 7  ;;  %p175_p5 = scmp.ne.s32.totalorder %s1226_s16, %s1222_s15 }
   0xb   : > { %s1734_s25 = smov (%p27_p0, %s26_s25), 0  ;;  %s1736_s26 = smov (!%p27_p0, %s29_s26), %s1246_s21 }
   0xc   : > { %1718 = sst [smem:[#allocation6_spill]] %s1734_s25  ;;  %s155_s27 = ssub.s32 %s1242_s20, %s1734_s25 }
   0xd   : > { %p1335_p3 = por %p170_p2, %p169_p1  ;;  %p31_p4 = scmp.ge.s32.totalorder %s1736_s26, 2 }
   0xe   : > { %p176_p6 = scmp.eq.s32.totalorder %s851_s24, 7  ;;  %p860_p7 = scmp.ge.s32.totalorder %s1250_s22, 1 }
   0xf   : > { %s1738_s26 = smov (%p31_p4, %s1736_s26), 0  ;;  %p248_p9 = scmp.lt.s32.totalorder %s1250_s22, 9 }
  0x10   : > { %1720 = sst [smem:[#allocation7_spill]] %s1738_s26  ;;  %p1344_p8 = por %p176_p6, %p175_p5 }
  0x11   : > { %s154_s30 = ssub.s32 %s1246_s21, %s1738_s26  ;;  %s159_s5 = sadd.s32 1, %s1230_s17 }
  0x12   : > { %s156_s6 = sor.u32 %s155_s27, %s154_s30  ;;  %p249_p10 = pnand %p860_p7, %p248_p9 }
  0x13   : > { %p157_p11 = scmp.eq.s32.totalorder %s156_s6, 0  ;;  %s862_s8 = sshll.u32 (!%p249_p10), %s1234_s18, 2  ;;  %v516_v9 = vld [vmem:[%s1713_s3 + $0x80] sm:$0xff] (!%p249_p10)  ;;  %v517_v10 = vld [vmem:[%s1713_s3 + $0x88] sm:$0xff] (!%p249_p10)  ;;  %v518_v18 = vld [vmem:[%s1713_s3 + $0x90] sm:$0xff] (!%p249_p10)  ;;  %v1254_v58 = vmov (!%p249_p10), 0.0  }
  0x14   : > { %252 = sbr.rel (%p249_p10) target bundleno = 520 (0x208), region = 36  ;;  %p303_p12 = scmp.lt.s32.totalorder (!%p249_p10), %s1238_s19, 1  ;;  %v970_v11 = vpack.c.bf16 (!%p249_p10), %v517_v10, %v516_v9  ;;  %v500_v12 = vld [vmem:[%s1713_s3] sm:$0xff] (!%p249_p10)  ;;  %v501_v13 = vld [vmem:[%s1713_s3 + $0x8] sm:$0xff] (!%p249_p10)  ;;  %v519_v21 = vld [vmem:[%s1713_s3 + $0x98] sm:$0xff] (!%p249_p10)  ;;  %vm376_vm0 = vcmask (!%p249_p10), 1040384  }
  0x15   : > { %s1353_s7 = scalar_select %p157_p11, %s1230_s17, %s159_s5  }
  0x16   : > { %p305_p13 = scmp.lt.s32.totalorder (!%p249_p10), %s862_s8, 15  ;;  %s893_s12 = sadd.s32 (!%p249_p10), 4, %s862_s8  ;;  %v548_v14 = vld [vmem:[%s1713_s3 + $0x180] sm:$0xff] (!%p249_p10)  ;;  %v972_v16 = vpack.c.bf16 (!%p249_p10), %v501_v13, %v500_v12  ;;  %v549_v17 = vld [vmem:[%s1713_s3 + $0x188] sm:$0xff] (!%p249_p10)  ;;  %971 = vmatprep.subr.bf16.mxu0 (!%p249_p10), %v970_v11  ;;  %v974_v25 = vpack.c.bf16 (!%p249_p10), %v519_v21, %v518_v18  ;;  %v502_v27 = vld [vmem:[%s1713_s3 + $0x10] sm:$0xff] (!%p249_p10)  ;;  %vm444_vm1 = vcmask (!%p249_p10), 261120  }
  0x17   : > { %p1361_p0 = scmp.lt.s32.totalorder (!%p249_p10), %s893_s12, 15  ;;  %p356_p1 = scmp.lt.s32.totalorder (!%p249_p10), %s1234_s18, 3  ;;  %v1002_v20 = vpack.c.bf16 (!%p249_p10), %v549_v17, %v548_v14  ;;  %v532_v22 = vld [vmem:[%s1713_s3 + $0x100] sm:$0xff] (!%p249_p10)  ;;  %v533_v23 = vld [vmem:[%s1713_s3 + $0x108] sm:$0xff] (!%p249_p10)  ;;  %v503_v28 = vld [vmem:[%s1713_s3 + $0x18] sm:$0xff] (!%p249_p10)  ;;  %vm451_vm2 = vcmask (!%p249_p10), 523264  }
  0x18   : > { %s1723_s0 = sld [smem:[#allocation8_spill]] (!%p249_p10)  ;;  %s1371_s5 = sadd.s32 (!%p249_p10), 4294967295, %s862_s8  ;;  %973 = vmatpush3.bf16.msra.mxu0 (!%p249_p10), %v972_v16  ;;  %v1004_v26 = vpack.c.bf16 (!%p249_p10), %v533_v23, %v532_v22  ;;  %v550_v29 = vld [vmem:[%s1713_s3 + $0x190] sm:$0xff] (!%p249_p10)  ;;  %v976_v31 = vpack.c.bf16 (!%p249_p10), %v503_v28, %v502_v27  ;;  %v551_v32 = vld [vmem:[%s1713_s3 + $0x198] sm:$0xff] (!%p249_p10)  ;;  %v520_v33 = vld [vmem:[%s1713_s3 + $0xa0] sm:$0xff] (!%p249_p10)  ;;  %vm458_vm3 = vcmask (!%p249_p10), 785408  }
  0x19   : > { %p314_p2 = scmp.gt.s32.totalorder (!%p249_p10), %s1371_s5, 0  ;;  %p867_p4 = scmp.lt.s32.totalorder (!%p249_p10), %s1371_s5, 15  ;;  %1003 = vmatprep.subr.bf16.mxu1 (!%p249_p10), %v1002_v20  ;;  %v521_v34 = vld [vmem:[%s1713_s3 + $0xa8] sm:$0xff] (!%p249_p10)  ;;  %975 = vmatprep.subr.bf16.mxu0 (!%p249_p10), %v974_v25  ;;  %v1006_v35 = vpack.c.bf16 (!%p249_p10), %v551_v32, %v550_v29  ;;  %v534_v37 = vld [vmem:[%s1713_s3 + $0x110] sm:$0xff] (!%p249_p10)  ;;  %v535_v38 = vld [vmem:[%s1713_s3 + $0x118] sm:$0xff] (!%p249_p10)  ;;  %vm471_vm4 = vcmask (!%p249_p10), 1046528  }
  0x1a   : > { %p350_p5 = scmp.gt.s32.totalorder (!%p249_p10), %s1234_s18, 0  ;;  %1005 = vmatpush3.bf16.msra.mxu1 (!%p249_p10), %v1004_v26  ;;  %v978_v36 = vpack.c.bf16 (!%p249_p10), %v521_v34, %v520_v33  ;;  %v504_v39 = vld [vmem:[%s1713_s3 + $0x20] sm:$0xff] (!%p249_p10)  ;;  %v1008_v42 = vpack.c.bf16 (!%p249_p10), %v535_v38, %v534_v37  ;;  %v505_v43 = vld [vmem:[%s1713_s3 + $0x28] sm:$0xff] (!%p249_p10)  ;;  %v522_v47 = vld [vmem:[%s1713_s3 + $0xb0] sm:$0xff] (!%p249_p10) }
  0x1b   : > { %s304_s9 = scalar_select %p303_p12, %s1238_s19, 1  ;;  %v552_v44 = vld [vmem:[%s1713_s3 + $0x1a0] sm:$0xff]  ;;  %1007 = vmatprep.subr.bf16.mxu1 %v1006_v35  ;;  %v980_v45 = vpack.c.bf16 %v505_v43, %v504_v39  ;;  %v553_v46 = vld [vmem:[%s1713_s3 + $0x1a8] sm:$0xff]  ;;  %v523_v48 = vld [vmem:[%s1713_s3 + $0xb8] sm:$0xff] }
  0x1c   : > { %s306_s10 = scalar_select %p305_p13, %s862_s8, 15  ;;  %977 = vmatpush3.bf16.msra.mxu0 %v976_v31  ;;  %v1010_v50 = vpack.c.bf16 %v553_v46, %v552_v44  ;;  %v982_v51 = vpack.c.bf16 %v523_v48, %v522_v47  ;;  %v536_v52 = vld [vmem:[%s1713_s3 + $0x120] sm:$0xff]  ;;  %v537_v53 = vld [vmem:[%s1713_s3 + $0x128] sm:$0xff]  ;;  %v506_v56 = vld [vmem:[%s1713_s3 + $0x30] sm:$0xff] }
  0x1d   : > { %s1358_s11 = sshll.u32 %s304_s9, 4  ;;  %s1740_s12 = smov (!%p1361_p0, %s893_s12), 15  ;;  %979 = vmatprep.subr.bf16.mxu0 %v978_v36  ;;  %v1012_v55 = vpack.c.bf16 %v537_v53, %v536_v52  ;;  %v507_v57 = vld [vmem:[%s1713_s3 + $0x38] sm:$0xff]  ;;  %v554_v61 = vld [vmem:[%s1713_s3 + $0x1b0] sm:$0xff]  ;;  %v524_v63 = vld [vmem:[%s1713_s3 + $0xc0] sm:$0xff] }
  0x1e   : > { %s308_s13 = sadd.s32 %s1358_s11, %s306_s10  ;;  %s1742_s12 = smov (!%p1361_p0, %s1740_s12), 15  ;;  %1009 = vmatpush3.bf16.msra.mxu1 %v1008_v42  ;;  %v984_v60 = vpack.c.bf16 %v507_v57, %v506_v56  ;;  %v555_v62 = vld [vmem:[%s1713_s3 + $0x1b8] sm:$0xff]  ;;  %v508_v10 = vld [vmem:[%s1713_s3 + $0x40] sm:$0xff]  ;;  %v509_v11 = vld [vmem:[%s1713_s3 + $0x48] sm:$0xff] }
  0x1f   : > { %s864_s23 = sshll.u32 %s308_s13, 3  ;;  %s337_s9 = sadd.s32 %s1358_s11, %s1742_s12  ;;  %1011 = vmatprep.subr.bf16.mxu1 %v1010_v50  ;;  %v556_v12 = vld [vmem:[%s1713_s3 + $0x1c0] sm:$0xff]  ;;  %v557_v13 = vld [vmem:[%s1713_s3 + $0x1c8] sm:$0xff]  ;;  %v526_v14 = vld [vmem:[%s1713_s3 + $0xd0] sm:$0xff]  ;;  %v988_v16 = vpack.c.bf16 %v509_v11, %v508_v10 }
  0x20   : > { %s1369_s30 = scalar_lea.vmem %s1723_s0, %s864_s23  ;;  %s1252_s10 = smov 96   ;;  %981 = vmatpush3.bf16.msra.mxu0 %v980_v45  ;;  %v1018_v17 = vpack.c.bf16 %v557_v13, %v556_v12  ;;  %v540_v18 = vld [vmem:[%s1713_s3 + $0x140] sm:$0xff]  ;;  %v541_v20 = vld [vmem:[%s1713_s3 + $0x148] sm:$0xff]  ;;  %v510_v21 = vld [vmem:[%s1713_s3 + $0x50] sm:$0xff] }
  0x21   : > { %v1374_v0 = vld [vmem:[%s1369_s30] sm:$0xff]  ;;  %v347_v1 = vld [vmem:[%s1369_s30 + $0x10] sm:$0xff]  ;;  %s357_s6 = scalar_select %p356_p1, 1, 0  ;;  %v1381_v4 = vld [vmem:[%s1369_s30 + $0x18] sm:$0xff]  ;;  %983 = vmatprep.subr.bf16.mxu0 %v982_v51  ;;  %v1020_v27 = vpack.c.bf16 %v541_v20, %v540_v18 }
  0x22   : > { %v383_v2 = vrot.slane %v1374_v0, 7  ;;  %v384_v3 = vrot.slane %v347_v1, 7  ;;  %v366_v5 = vrot.slane %v1381_v4, 7  ;;  %s879_s13 = sshll.u32 %s337_s9, 3  ;;  %v1438_v24 = vld [vmem:[%s1369_s30 + $0x8] sm:$0xff]  ;;  %1013 = vmatpush3.bf16.msra.mxu1 %v1012_v55  ;;  %v511_v23 = vld [vmem:[%s1713_s3 + $0x58] sm:$0xff] }
  0x23   : > { %s358_s8 = scvt.s32.f32 %s357_s6  ;;  %s339_s0 = scalar_lea.vmem %s1712_s2, %s879_s13  ;;  %v1121_v41 = vpack.i.bf16 %v1381_v4, %v1438_v24  ;;  %v538_v4 = vld [vmem:[%s1713_s3 + $0x130] sm:$0xff]  ;;  %v559_v25 = vld [vmem:[%s1713_s3 + $0x1d8] sm:$0xff]  ;;  %v992_v29 = vpack.c.bf16 %v511_v23, %v510_v21  ;;  %v529_v31 = vld [vmem:[%s1713_s3 + $0xe8] sm:$0xff] }
  0x24   : > { %v1111_v6 = vpack.i.bf16 %v384_v3, %v383_v2  ;;  %v1389_v7 = vpack.i.bf16 %v366_v5, %v347_v1  ;;  %v355_v15 = vld [vmem:[%s339_s0] sm:$0xff]  ;;  %s315_s24 = scalar_select %p314_p2, %s1371_s5, 0  ;;  %v1126_v1 = vpack.i.bf16 %v1254_v58, %v1374_v0  ;;  %v1014_v2 = vpack.c.bf16 %v555_v62, %v554_v61  ;;  %v525_v3 = vld [vmem:[%s1713_s3 + $0xc8] sm:$0xff]  ;;  %v539_v5 = vld [vmem:[%s1713_s3 + $0x138] sm:$0xff]  ;;  %985 = vmatpush3.bf16.msra.mxu0 %v984_v60 }
  0x25   : > { %v359_v8 = vstv %s358_s8  ;;  %s1424_s12 = scalar_select %p350_p5, 1, 0  ;;  %v986_v0 = vpack.c.bf16 %v525_v3, %v524_v63  ;;  %v1016_v9 = vpack.c.bf16 %v539_v5, %v538_v4  ;;  %v542_v32 = vld [vmem:[%s1713_s3 + $0x150] sm:$0xff]  ;;  %v543_v34 = vld [vmem:[%s1713_s3 + $0x158] sm:$0xff]  ;;  %v512_v35 = vld [vmem:[%s1713_s3 + $0x60] sm:$0xff] }
  0x26   : > { %1112 = vrot.lane.b32.xlu0 %v1111_v6, %s1252_s10  ;;  %v1420_v19 = vmul.f32 %v359_v8, %v355_v15  ;;  %s1744_s24 = smov (!%p867_p4, %s315_s24), 15  ;;  %v365_v8 = vrot.slane %v1438_v24, 7  ;;  %1015 = vmatprep.subr.bf16.mxu1 %v1014_v2  ;;  %v527_v15 = vld [vmem:[%s1713_s3 + $0xd8] sm:$0xff]  ;;  %v558_v24 = vld [vmem:[%s1713_s3 + $0x1d0] sm:$0xff]  ;;  %v513_v36 = vld [vmem:[%s1713_s3 + $0x68] sm:$0xff]  ;;  %v1024_v37 = vpack.c.bf16 %v543_v34, %v542_v32  ;;  %s1255_s23 = smov 64  }
  0x27   : > { %s352_s5 = scvt.s32.f32 %s1424_s12  ;;  %s321_s27 = sadd.s32 %s1744_s24, %s1358_s11  ;;  %987 = vmatprep.subr.bf16.mxu0 %v986_v0  ;;  %v990_v22 = vpack.c.bf16 %v527_v15, %v526_v14  ;;  %1017 = vmatpush3.bf16.msra.mxu1 %v1016_v9  ;;  %v1022_v28 = vpack.c.bf16 %v559_v25, %v558_v24  ;;  %v996_v38 = vpack.c.bf16 %v513_v36, %v512_v35  ;;  %v560_v39 = vld [vmem:[%s1713_s3 + $0x1e0] sm:$0xff]  ;;  %v530_v42 = vld [vmem:[%s1713_s3 + $0xf0] sm:$0xff]  ;;  %v531_v43 = vld [vmem:[%s1713_s3 + $0xf8] sm:$0xff] }
  0x28   : > { %v385_v30 = vrot.slane %v1420_v19, 7  ;;  %s873_s8 = sshll.u32 %s321_s27, 3  ;;  %1019 = vmatprep.subr.bf16.mxu1 %v1018_v17  ;;  %989 = vmatpush3.bf16.msra.mxu0 %v988_v16  ;;  %v544_v44 = vld [vmem:[%s1713_s3 + $0x160] sm:$0xff]  ;;  %v998_v45 = vpack.c.bf16 %v531_v43, %v530_v42  ;;  %v545_v46 = vld [vmem:[%s1713_s3 + $0x168] sm:$0xff]  ;;  %v514_v47 = vld [vmem:[%s1713_s3 + $0x70] sm:$0xff]  ;;  %s881_s13 = sshll.u32 %s1234_s18, 1 }
  0x29   : > { %v353_v40 = vstv %s352_s5  ;;  %s323_s12 = scalar_lea.vmem %s1711_s1, %s873_s8  ;;  %991 = vmatprep.subr.bf16.mxu0 %v990_v22  ;;  %v515_v48 = vld [vmem:[%s1713_s3 + $0x78] sm:$0xff]  ;;  %v562_v51 = vld [vmem:[%s1713_s3 + $0x1f0] sm:$0xff]  ;;  %s882_s5 = sshll.u32 %s1238_s19, 3 }
  0x2a   : > { %390 = vrot.lane.b32.xlu0 %v385_v30, %s1252_s10  ;;  %v349_v49 = vld [vmem:[%s323_s12] sm:$0xff]  ;;  %s1253_s12 = smov 32   ;;  %v1000_v50 = vpack.c.bf16 %v515_v48, %v514_v47  ;;  %v563_v52 = vld [vmem:[%s1713_s3 + $0x1f8] sm:$0xff]  ;;  %s729_s25 = sadd.s32 %s882_s5, %s881_s13 }
  0x2b   : > { %v354_v54 = vmul.f32 %v353_v40, %v349_v49  ;;  %1021 = vmatpush3.bf16.msra.mxu1 %v1020_v27  ;;  %v528_v30 = vld [vmem:[%s1713_s3 + $0xe0] sm:$0xff]  ;;  %v561_v40 = vld [vmem:[%s1713_s3 + $0x1e8] sm:$0xff]  ;;  %v1028_v49 = vpack.c.bf16 %v545_v46, %v544_v44  ;;  %v1030_v53 = vpack.c.bf16 %v563_v52, %v562_v51  ;;  %v547_v55 = vld [vmem:[%s1713_s3 + $0x178] sm:$0xff]  ;;  %s883_s0 = sshll.u32 %s729_s25, 7  ;;  %s1256_s11 = smov [#allocation3]  }
  0x2c   : > { %1023 = vmatprep.subr.bf16.mxu1 %v1022_v28  ;;  %993 = vmatpush3.bf16.msra.mxu0 %v992_v29  ;;  %v994_v33 = vpack.c.bf16 %v529_v31, %v528_v30  ;;  %s1653_s6 = scalar_lea.hbm %s1714_s4, %s883_s0  ;;  %s1160_s24 = sshll.u32 %s1256_s11, 4  ;;  %s1161_s24 = int_to_ptr.vmem [resolvable:$false] %s1160_s24 }
  0x2d   : > { %v1116_v59 = vpack.i.bf16 %v1254_v58, %v354_v54  ;;  %v364_v6 = vrot.slane %v354_v54, 7  ;;  %v546_v54 = vld [vmem:[%s1713_s3 + $0x170] sm:$0xff]  ;;  %s1162_s9 = scalar_lea.vmem %s1161_s24, 512 }
  0x2e   : > { %1122 = vrot.lane.b32.xlu0 %v1121_v41, %s1253_s12  ;;  %995 = vmatprep.subr.bf16.mxu0 %v994_v33  ;;  %v1026_v41 = vpack.c.bf16 %v561_v40, %v560_v39  ;;  %v1032_v56 = vpack.c.bf16 %v547_v55, %v546_v54 }
  0x2f   : > { %1117 = vrot.lane.b32.xlu1 %v1116_v59, %s1253_s12  ;;  %v1131_v26 = vpack.i.bf16 %v365_v8, %v364_v6  ;;  %1025 = vmatpush3.bf16.msra.mxu1 %v1024_v37 }
  0x30   : > { %997 = vmatpush3.bf16.msra.mxu0 %v996_v38  ;;  %1027 = vmatprep.subr.bf16.mxu1 %v1026_v41 }
  0x31   : > { %999 = vmatprep.subr.bf16.mxu0 %v998_v45 }
  0x33   : > { %1127 = vrot.lane.b32.xlu1 %v1126_v1, %s1252_s10  ;;  %1029 = vmatpush3.bf16.msra.mxu1 %v1028_v49 }
  0x34   : > { %1001 = vmatpush3.bf16.msra.mxu0 %v1000_v50  ;;  %1031 = vmatprep.subr.bf16.mxu1 %v1030_v53 }
  0x37   : > { %1132 = vrot.lane.b32.xlu1 %v1131_v26, %s1252_s10  ;;  %1033 = vmatpush3.bf16.msra.mxu1 %v1032_v56 }
  0x98   : > { %v1113_v57 = vpop.permute.xlu0 %1112 }
  0x99   : > { %v1115_v58 = vunpack.i.h.bf16 %v1113_v57  ;;  %v1114_v59 = vunpack.i.l.bf16 %v1113_v57 }
  0x9b   : > { %v396_v60 = vsel %vm376_vm0, 0.0, %v1115_v58  ;;  %v395_v61 = vsel %vm376_vm0, 0.0, %v1114_v59 }
  0x9c   : > { %v1141_v62 = vpack.i.bf16 %v1115_v58, %v396_v60  ;;  %v1136_v63 = vpack.i.bf16 %v1114_v59, %v395_v61  ;;  %v391_v1 = vpop.permute.xlu0 %390 }
  0x9d   : > { %v397_v2 = vsel %vm376_vm0, 0.0, %v391_v1 }
  0x9e   : > { %1142 = vrot.lane.b32.xlu0 %v1141_v62, %s1255_s23  ;;  %1137 = vrot.lane.b32.xlu1 %v1136_v63, %s1255_s23  ;;  %v1151_v3 = vpack.i.bf16 %v391_v1, %v397_v2 }
  0xa0   : > { %v1123_v8 = vpop.permute.xlu0 %1122 }
  0xa1   : > { %v1118_v4 = vpop.permute.xlu1 %1117  ;;  %v1124_v15 = vunpack.i.l.bf16 %v1123_v8  ;;  %v1125_v38 = vunpack.i.h.bf16 %v1123_v8 }
  0xa2   : > { %1147 = vrot.lane.b32.xlu0 %v1389_v7, %s1252_s10  ;;  %1152 = vrot.lane.b32.xlu1 %v1151_v3, %s1255_s23  ;;  %v1120_v9 = vunpack.i.h.bf16 %v1118_v4  ;;  %v1119_v10 = vunpack.i.l.bf16 %v1118_v4 }
  0xa5   : > { %v1128_v5 = vpop.permute.xlu1 %1127 }
  0xa6   : > { %438 = vrot.lane.b32.xlu0 %v1420_v19, %s1252_s10  ;;  %v1130_v13 = vunpack.i.h.bf16 %v1128_v5  ;;  %v1129_v14 = vunpack.i.l.bf16 %v1128_v5  ;;  %s299_s10 = sand.u32 1, %s1226_s16  }
  0xa7   : > { %s861_s27 = sshll.u32 %s299_s10, 4  ;;  %s1658_s30 = scalar_lea.sflag [#allocation4], %s299_s10 }
  0xa8   : > { %s301_s26 = scalar_lea.vmem [#allocation3], %s861_s27 }
  0xa9   : > { %v1133_v6 = vpop.permute.xlu1 %1132  ;;  %s732_s12 = sshll.u32 %s301_s26, 4  ;;  %s1655_s12 = int_to_ptr.vmem [resolvable:$true] %s732_s12 }
  0xaa   : > { %v1134_v0 = vunpack.i.l.bf16 %v1133_v6  ;;  %v1135_v11 = vunpack.i.h.bf16 %v1133_v6  ;;  %s1156_s8 = scalar_lea.vmem %s1655_s12, 256  ;;  %p1163_p10 = scmp.lt.s32.totalorder %s1655_s12, %s1161_s24 }
  0xab   : > { %p1157_p6 = scmp.ne.s32.totalorder %s1655_s12, %s1156_s8  ;;  %p1164_p11 = scmp.lt.s32.totalorder %s1162_s9, %s1156_s8 }
  0xac   : > { %v377_v12 = vsel %vm376_vm0, 0.0, %v1134_v0  ;;  %v378_v19 = vsel %vm376_vm0, 0.0, %v1135_v11  ;;  %v448_v21 = vsel %vm444_vm1, %v1135_v11, %v1120_v9  ;;  %v446_v23 = vsel %vm444_vm1, %v1134_v0, %v1120_v9 }
  0xad   : > { %v445_v22 = vsel %vm444_vm1, %v377_v12, %v1119_v10  ;;  %v447_v28 = vsel %vm444_vm1, %v378_v19, %v1124_v15  ;;  %p1158_p7 = pnand %p1157_p6, %p1335_p3  ;;  %p1165_p12 = por %p1164_p11, %p1163_p10 }
  0xaf   : > { %p1159_p9 = pneg %p1158_p7 }
  0xb1   : > { %p1166_p13 = pnand %p1165_p12, %p1159_p9 }
 0x110   : > { %v1143_v7 = vpop.permute.xlu0 %1142  ;;  %v1138_v16 = vpop.permute.xlu1 %1137 }
 0x111   : > { %v1145_v17 = vunpack.i.h.bf16 %v1143_v7  ;;  %v1140_v18 = vunpack.i.h.bf16 %v1138_v16  ;;  %v1139_v20 = vunpack.i.l.bf16 %v1138_v16  ;;  %v1144_v24 = vunpack.i.l.bf16 %v1143_v7 }
 0x113   : > { %v455_v25 = vsel %vm451_vm2, %v448_v21, %v1145_v17  ;;  %v453_v26 = vsel %vm451_vm2, %v446_v23, %v1140_v18  ;;  %v452_v27 = vsel %vm451_vm2, %v445_v22, %v1139_v20  ;;  %v454_v39 = vsel %vm451_vm2, %v447_v28, %v1144_v24 }
 0x114   : > { %v1148_v29 = vpop.permute.xlu0 %1147  ;;  %v459_v30 = vsel %vm458_vm3, %v452_v27, %v1129_v14  ;;  %v460_v31 = vsel %vm458_vm3, %v453_v26, %v1130_v13  ;;  %v462_v32 = vsel %vm458_vm3, %v455_v25, %v1130_v13  ;;  %v1153_v35 = vpop.permute.xlu1 %1152 }
 0x115   : > { %v1150_v33 = vunpack.i.h.bf16 %v1148_v29  ;;  %v1149_v34 = vunpack.i.l.bf16 %v1148_v29  ;;  %v472_v36 = vrot.slane %v459_v30, 1  ;;  %v473_v37 = vrot.slane %v460_v31, 1 }
 0x116   : > { %v1155_v40 = vunpack.i.h.bf16 %v1153_v35  ;;  %v1154_v41 = vunpack.i.l.bf16 %v1153_v35  ;;  %v476_v50 = vrot.slane %v462_v32, 1 }
 0x117   : > { %v379_v42 = vsel %vm376_vm0, 0.0, %v1150_v33  ;;  %v450_v43 = vsel %vm444_vm1, %v1150_v33, %v1120_v9  ;;  %v461_v44 = vsel %vm458_vm3, %v454_v39, %v1149_v34  ;;  %v474_v45 = vsel %vm471_vm4, %v472_v36, %v473_v37 }
 0x118   : > { %v449_v46 = vsel %vm444_vm1, %v379_v42, %v1125_v38  ;;  %v457_v47 = vsel %vm451_vm2, %v450_v43, %v1155_v40  ;;  %628 = vmatprep.mubr.f32.mxu0 %v474_v45  ;;  %v439_v48 = vpop.permute.xlu0 %438  ;;  %v475_v49 = vrot.slane %v461_v44, 1 }
 0x119   : > { %v456_v51 = vsel %vm451_vm2, %v449_v46, %v1154_v41  ;;  %629 = vmatmul.mubr.f32.vlgmr.msra.gmra.mrb[0].mxu0 %v459_v30  ;;  %v464_v52 = vsel %vm458_vm3, %v457_v47, %v1130_v13 }
 0x11a   : > { %v463_v53 = vsel %vm458_vm3, %v456_v51, %v439_v48  ;;  %v477_v54 = vsel %vm471_vm4, %v475_v49, %v476_v50  ;;  %v487_v55 = vrot.slane %v464_v52, 1 }
 0x11b   : > { %v486_v56 = vrot.slane %v463_v53, 1  ;;  %633 = vmatprep.mubr.f32.mxu0 %v477_v54  ;;  %703 = vmatprep.mubr.f32.mxu1 %v477_v54 }
 0x11c   : > { %704 = vmatmul.mubr.f32.vlgmr.msra.gmra.mrb[0].mxu1 %v461_v44 }
 0x11d   : > { %634 = vmatmul.mubr.f32.gmra.mrb[2].mxu0 %v461_v44  ;;  %v488_v57 = vsel %vm471_vm4, %v486_v56, %v487_v55 }
 0x11e   : > { %708 = vmatprep.mubr.f32.mxu1 %v488_v57 }
 0x120   : > { %709 = vmatmul.mubr.f32.gmra.mrb[2].mxu1 %v463_v53 }
 0x1ec   : > { %v926_v58 = vpop.f32.mrb[0].mxu0 }
 0x1ed   : > { %v927_v59 = vpop.f32.mrb[1].mxu0 }
 0x1ee   : > { %v928_v60 = vadd.f32 %v927_v59, %v926_v58 }
 0x1ef   : > { %v964_v61 = vpop.f32.mrb[0].mxu1 }
 0x1f0   : > { %v929_v62 = vpop.f32.mrb[2].mxu0  ;;  %v965_v63 = vpop.f32.mrb[1].mxu1 }
 0x1f1   : > { %v966_v1 = vadd.f32 %v965_v63, %v964_v61  ;;  %v930_v2 = vpop.f32.mrb[3].mxu0 }
 0x1f2   : > { %v931_v3 = vadd.f32 %v930_v2, %v929_v62 }
 0x1f3   : > { %v706_v4 = vadd.f32 %v966_v1, %v928_v60  ;;  %v967_v5 = vpop.f32.mrb[2].mxu1 }
 0x1f4   : > { %v968_v6 = vpop.f32.mrb[3].mxu1 }
 0x1f5   : > { %714 = vst.msk [vmem:[%s301_s26] sm:$0xff] %vm451_vm2, %v706_v4  ;;  %v969_v8 = vadd.f32 %v968_v6, %v967_v5 }
 0x1f7   : > { %v711_v0 = vadd.f32 %v969_v8, %v931_v3 }
 0x1f9   : > { %715 = vst.msk [vmem:[%s301_s26 + $0x8] sm:$0xff] %vm451_vm2, %v711_v0 }
 0x1fa   : > { %1169 = shalt.err (!%p1166_p13)
}
 0x1fb   : > { %s1170_s14 = scalar_lea.hbm %s1653_s6, 256  ;;  %s1174_s13 = scalar_lea.hbm %s1714_s4, 2048 }
 0x1fc   : > { %p1171_p0 = scmp.ne.s32.totalorder %s1653_s6, %s1170_s14  ;;  %p1175_p4 = scmp.lt.u32.totalorder %s1653_s6, %s1714_s4 }
 0x1fd   : > { %p1176_p5 = scmp.lt.u32.totalorder %s1174_s13, %s1170_s14  ;;  %p1178_p7 = scmp.lt.u32.totalorder %s1170_s14, %s1653_s6 }
 0x1fe   : > { %p1172_p1 = pnand %p1171_p0, %p1335_p3 }
 0x1ff   : > { %p1177_p6 = por %p1176_p5, %p1175_p4 }
 0x200   : > { %p1173_p2 = pneg %p1172_p1 }
 0x201   : > { %p1179_p9 = por %p1178_p7, %p1177_p6 }
 0x203   : > { %p1180_p10 = pnand %p1179_p9, %p1173_p2 }
 0x205   : > { %1183 = shalt.err (!%p1180_p10)
}
 0x206   : > { %s1257_s25 = smov 128   ;;  %s1258_s26 = smov 8  }
 0x207   : > { %1034 = dma.vmem_to_hbm [thread:$0]  (%p1335_p3), %s1655_s12, 256, %s1653_s6, %s1658_s30, %s1257_s25, %s1257_s25, %s1258_s26  }
 0x208 PF: > { %p1040_p11 = scmp.ge.s32.totalorder %s1250_s22, 2  ;;  %s747_s0 = sand.u32 1, %s1222_s15  }
 0x209   : > { %s748_s18 = scalar_lea.sflag [#allocation4], %s747_s0 }
 0x20a   : > { %p1037_p12 = pnand %p1040_p11, %p1344_p8 }
 0x20c   : > { %1217 = dma.done.wait (!%p1037_p12), %s748_s18, 256  }
 0x20d   : > { %1219 = vsyncadd (!%p1037_p12), %s748_s18, 4294967040  ;;  %s17_s22 = sadd.s32 1, %s1250_s22   ;;  %s1724_s28 = sld [smem:[#allocation6_spill]] }
 0x20e   : > { %p14_p13 = scmp.ge.s32.totalorder %s17_s22, 10   ;;  %s1725_s12 = sld [smem:[#allocation7_spill]] }
 0x20f   : > { %s1726_s15 = smov %s1226_s16  ;;  %s1727_s16 = smov %s1230_s17 }
 0x210   : > { %s1728_s17 = smov %s1353_s7  ;;  %s1729_s18 = smov %s1242_s20 }
 0x211   : > { %s1730_s19 = smov %s1246_s21  ;;  %16 = sbr.rel (!%p14_p13) target bundleno = 7 (0x7), region = 77 }
 0x213   : > { %s1731_s20 = smov %s1724_s28 }
 0x214   : > { %s1732_s21 = smov %s1725_s12 }
 0x218   :  { %753 = vsyncpa [#allocation4], 1 }
 0x219   :  { %755 = vsyncpa [#allocation4 + $0x1], 1 }

</bundles_post_ra>
